<compile_context>
chip_gen: v6e
topology: v6e:2x2x1
jax: 0.10.0
libtpu: 0.0.40
codegen_flags: <defaults>
</compile_context>

<pallas_src>
from functools import partial

import jax
import jax.numpy as jnp
import numpy as np
from jax.experimental import pallas as pl
from jax.experimental.pallas import tpu as pltpu

_LANE = 128
# Above the v5e/v6e scoped defaults, below v7x's 64 MiB physical VMEM (with room).
_VMEM_LIMIT = 48 * 1024 * 1024


def _pick_tile(n):
    # Largest lane-aligned square tile that fits inside the (possibly ragged)
    # array.  The array is never padded up to the tile; ragged edges become
    # partial blocks handled in-kernel.
    for t in (512, 384, 256, 128):
        if t <= n:
            return t
    return n


def _fused_kernel(scal_ref,
                  u_ij_ref, u_ji_ref, m_ij_ref, m_ji_ref,
                  ah_ij_ref, ah_ji_ref, lambd_ref,
                  ahat_out_ref, a_out_ref, colsum_ref, lambd_out_ref,
                  *, n_valid, mask_rows):
    """Fused step over the (j = column tile [parallel], i = row tile [reduction]) grid.

    Emits A_hat_new[i, j] and A_new[i, j], accumulates column sums of A_new over
    the row-tile axis into a revisited (1, tile) block and produces the lambd
    update on the last row tile.  All transposed quantities are derived from the
    (j, i) operand tiles, so only (tile, tile) values ever go through the XLU.
    """
    f32 = jnp.float32
    c_a = scal_ref[0]       # alpha * y_a
    thr = scal_ref[1]       # p * alpha * y_a  (soft-threshold)
    g2 = scal_ref[2]        # 2 * g_scalar
    c_b = scal_ref[3]       # beta * y_b
    i = pl.program_id(1)    # row-tile index (reduction axis, innermost)

    # Mask tiles: consumed as int8 (or f32) and widened on the VPU (idle slots).
    m_ij = m_ij_ref[...].astype(f32)
    m_ji = m_ji_ref[...].astype(f32)

    # Symmetric coupling G = 0.5 * (U + U^T) - 2 * g_scalar.  G is symmetric, so
    # the (j, i) tile is just the transpose of the (i, j) tile.
    g_ij = 0.5 * (u_ij_ref[...] + u_ji_ref[...].T) - g2
    g_ji = g_ij.T

    def soft_clip(a_hat, m, g):
        # relu(|x| - thr) followed by 1 - relu(1 - .)  ==  clip(|x| - thr, 0, 1).
        a_dot = a_hat + (c_a * a_hat) * (m * g)
        return jnp.minimum(jnp.maximum(jnp.abs(a_dot) - thr, 0.0), 1.0)

    ahn_ij = soft_clip(ah_ij_ref[...], m_ij, g_ij)   # A_hat_new[i, j]
    ahn_ji = soft_clip(ah_ji_ref[...], m_ji, g_ji)   # A_hat_new[j, i] (recomputed
                                                     # in-register: no HBM round-trip)

    a_new = 0.5 * (ahn_ij * ahn_ij + (ahn_ji * ahn_ji).T) * m_ij

    ahat_out_ref[...] = ahn_ij
    a_out_ref[...] = a_new

    @pl.when(i == 0)
    def _():
        colsum_ref[...] = jnp.zeros_like(colsum_ref)
        # Initialize the revisited lambd block too — never rely on an
        # uninitialized revisited output block (review robustness concern).
        lambd_out_ref[...] = lambd_ref[...]

    if mask_rows:
        # Ragged edge: rows >= n_valid of this block are OOB garbage (or zero
        # padding for tiny N).  Use a select (not a multiply) so NaN/Inf garbage
        # cannot leak into the column sums.
        t_rows = a_new.shape[0]
        rows = jax.lax.broadcasted_iota(jnp.int32, a_new.shape, 0) + i * t_rows
        contrib = jnp.where(rows < n_valid, a_new, 0.0)
    else:
        contrib = a_new
    # torch A.sum(dim=1) on a (1, N, N) tensor == column sums of the (N, N) slice.
    colsum_ref[...] += jnp.sum(contrib, axis=0, keepdims=True)

    @pl.when(i == pl.num_programs(1) - 1)
    def _():
        lambd_out_ref[...] = lambd_ref[...] + c_b * jnp.maximum(
            colsum_ref[...] - 1.0, 0.0)


@jax.jit
def ppcell_forward(params, U, M, A, A_hat, lambd):
    """PPcell forward.  U/M/A/A_hat: (1, N, N); lambd: (1, N).

    Returns (lambd_new, A_new, A_hat_new, A_new.sum()).  The last value stands in
    for the module's `print(A.sum())` — A has been rebound to tau(A_hat) at that
    point, so it is the sum of the *new* A.
    """
    B, N, _ = A.shape
    assert B == 1, "PPcell broadcasting is only well-defined for batch size 1"
    f32 = jnp.float32
    u2 = U.reshape(N, N).astype(f32)
    a2 = A.reshape(N, N).astype(f32)
    ah2 = A_hat.reshape(N, N).astype(f32)
    l2 = lambd.reshape(1, N).astype(f32)
    # The mask keeps whatever dtype it arrives in; supply it as int8 (it is a
    # binary {0,1} mask in this post-processing use) to cut its HBM traffic 4x.
    m2 = M.reshape(N, N)

    alpha, beta, y_a, y_b, p, k = (params[i].astype(f32) for i in range(6))

    # Global scalar reduction hoisted out of the tiled kernel (the only use of
    # the *input* A) and fed through SMEM scalar prefetch.
    col_sum_in = jnp.sum(a2, axis=0)                        # == torch A.sum(dim=1)
    g_scalar = jnp.sum(l2[0] * jax.nn.sigmoid((col_sum_in - 1.0) * k))
    scal = jnp.stack([alpha * y_a,            # c_a
                      p * alpha * y_a,        # soft threshold
                      2.0 * g_scalar,         # 2 * g
                      beta * y_b]).astype(f32)

    # ---- tiling: no wrapper pads/slices for N >= 128 (ragged handled in-kernel);
    # ---- only tiny inputs (N < 128) get padded once to a single aligned block.
    if N < _LANE:
        n_arr = _LANE
        pad2 = ((0, n_arr - N), (0, n_arr - N))
        u_a = jnp.pad(u2, pad2)
        m_a = jnp.pad(m2, pad2)
        ah_a = jnp.pad(ah2, pad2)
        l_a = jnp.pad(l2, ((0, 0), (0, n_arr - N)))
    else:
        n_arr = N
        u_a, m_a, ah_a, l_a = u2, m2, ah2, l2

    tile = _pick_tile(n_arr)
    nt = pl.cdiv(n_arr, tile)
    mask_rows = (N % tile) != 0            # some row tile contains rows >= N

    kernel = partial(_fused_kernel, n_valid=N, mask_rows=mask_rows)

    grid_spec = pltpu.PrefetchScalarGridSpec(
        num_scalar_prefetch=1,
        grid=(nt, nt),                                            # (j, i)
        in_specs=[
            pl.BlockSpec((tile, tile), lambda j, i, s: (i, j)),   # U[i, j]
            pl.BlockSpec((tile, tile), lambda j, i, s: (j, i)),   # U[j, i]
            pl.BlockSpec((tile, tile), lambda j, i, s: (i, j)),   # M[i, j]
            pl.BlockSpec((tile, tile), lambda j, i, s: (j, i)),   # M[j, i]
            pl.BlockSpec((tile, tile), lambda j, i, s: (i, j)),   # A_hat[i, j]
            pl.BlockSpec((tile, tile), lambda j, i, s: (j, i)),   # A_hat[j, i]
            pl.BlockSpec((1, tile), lambda j, i, s: (0, j)),      # lambd
        ],
        out_specs=[
            pl.BlockSpec((tile, tile), lambda j, i, s: (i, j)),   # A_hat_new
            pl.BlockSpec((tile, tile), lambda j, i, s: (i, j)),   # A_new
            pl.BlockSpec((1, tile), lambda j, i, s: (0, j)),      # col sums (acc)
            pl.BlockSpec((1, tile), lambda j, i, s: (0, j)),      # lambd_new
        ],
    )

    ahat_new, a_new, colsum, lambd_new = pl.pallas_call(
        kernel,
        out_shape=(jax.ShapeDtypeStruct((n_arr, n_arr), f32),
                   jax.ShapeDtypeStruct((n_arr, n_arr), f32),
                   jax.ShapeDtypeStruct((1, n_arr), f32),
                   jax.ShapeDtypeStruct((1, n_arr), f32)),
        grid_spec=grid_spec,
        compiler_params=pltpu.CompilerParams(
            dimension_semantics=("parallel", "arbitrary"),
            vmem_limit_bytes=_VMEM_LIMIT),
    )(scal, u_a, u_a, m_a, m_a, ah_a, ah_a, l_a)

    # TODO(synk): the reference module does `print(A.sum())`; the scalar is
    # derived from the in-kernel column sums and returned instead of printed.
    asum = jnp.sum(colsum[0, :N])

    if n_arr != N:           # only the tiny (N < 128) padded path needs slicing
        ahat_new = ahat_new[:N, :N]
        a_new = a_new[:N, :N]
        lambd_new = lambd_new[:, :N]

    return (lambd_new.reshape(B, N),
            a_new.reshape(B, N, N),
            ahat_new.reshape(B, N, N),
            asum)


def ppcell_ref(params, U, M, A, A_hat, lambd):
    """Pure-JAX transcription of the PyTorch forward (batch = 1)."""
    alpha, beta, y_a, y_b, p, k = (params[i] for i in range(6))
    B, N, _ = A.shape
    ones = jnp.ones((B, N), jnp.float32)
    g = 0.5 * U - jnp.matmul(lambd * jax.nn.sigmoid((A.sum(axis=1) - ones) * k),
                             ones.T)
    A_dot = A_hat + alpha * y_a * A_hat * M * (g + jnp.swapaxes(g, 1, 2))
    A_hat2 = jax.nn.relu(jnp.abs(A_dot) - p * alpha * y_a)
    A_hat2 = 1.0 - jax.nn.relu(1.0 - A_hat2)
    sq = A_hat2 * A_hat2
    A2 = 0.5 * (sq + jnp.swapaxes(sq, 1, 2)) * M
    lambd2 = lambd + beta * y_b * jax.nn.relu(A2.sum(axis=1) - 1.0)
    return lambd2, A2, A_hat2, A2.sum()


def _run_case(key, N, rtol, atol, mask_dtype=jnp.float32):
    kp, ku, km, ka, kah, kl = jax.random.split(key, 6)
    B = 1
    params = jax.random.normal(kp, (6,), jnp.float32)   # alpha, beta, y_a, y_b, p, k
    U = jax.random.normal(ku, (B, N, N), jnp.float32)
    M = (jax.random.uniform(km, (B, N, N)) > 0.5).astype(jnp.float32)
    A = jax.random.uniform(ka, (B, N, N), dtype=jnp.float32)
    A_hat = jax.random.uniform(kah, (B, N, N), dtype=jnp.float32)
    lambd = jax.random.normal(kl, (B, N), jnp.float32)

    outs = ppcell_forward(params, U, M.astype(mask_dtype), A, A_hat, lambd)
    jax.block_until_ready(outs)
    lambd_o, a_o, ahat_o, asum = outs

    rl, ra, rah, rsum = ppcell_ref(params, U, M, A, A_hat, lambd)
    np.testing.assert_allclose(np.asarray(lambd_o), np.asarray(rl), rtol=rtol, atol=atol)
    np.testing.assert_allclose(np.asarray(a_o), np.asarray(ra), rtol=rtol, atol=atol)
    np.testing.assert_allclose(np.asarray(ahat_o), np.asarray(rah), rtol=rtol, atol=atol)
    np.testing.assert_allclose(np.asarray(asum), np.asarray(rsum),
                               rtol=max(rtol, 1e-4), atol=max(atol, 1e-4))


if __name__ == "__main__":
    key = jax.random.PRNGKey(0)
    k1, k2, k3 = jax.random.split(key, 3)
    # Tiny case (N < 128): padded once to a single aligned 128-block.
    _run_case(k1, 16, rtol=1e-5, atol=1e-5)
    # Aligned case: single full-array 256-block, int8-mask fast path.
    _run_case(k2, 256, rtol=1e-3, atol=1e-3, mask_dtype=jnp.int8)
    # Ragged case (no wrapper padding / slicing): 2x2 grid of 256-tiles with
    # partial edge blocks and in-kernel row masking of the column-sum accumulator.
    _run_case(k3, 300, rtol=2e-3, atol=2e-3)
    print("KERNEL_OK")
</pallas_src>

<mosaic_0001>
module attributes {stable_mosaic.version = 11 : i64} {
  func.func @_fused_kernel(%arg0: i32, %arg1: i32, %arg2: memref<4xf32, #tpu.memory_space<smem>>, %arg3: memref<128x128xf32, #tpu.memory_space<vmem>>, %arg4: memref<128x128xf32, #tpu.memory_space<vmem>>, %arg5: memref<128x128xf32, #tpu.memory_space<vmem>>, %arg6: memref<128x128xf32, #tpu.memory_space<vmem>>, %arg7: memref<128x128xf32, #tpu.memory_space<vmem>>, %arg8: memref<128x128xf32, #tpu.memory_space<vmem>>, %arg9: memref<1x128xf32, #tpu.memory_space<vmem>>, %arg10: memref<128x128xf32, #tpu.memory_space<vmem>>, %arg11: memref<128x128xf32, #tpu.memory_space<vmem>>, %arg12: memref<1x128xf32, #tpu.memory_space<vmem>>, %arg13: memref<1x128xf32, #tpu.memory_space<vmem>>) attributes {dimension_semantics = [#tpu.dimension_semantics<parallel>, #tpu.dimension_semantics<arbitrary>], iteration_bounds = array<i64: 1, 1>, scalar_prefetch = 1 : i64, scratch_operands = 0 : i64, tpu.core_type = #tpu.core_type<tc>, window_params = [{transform_indices = @transform_0, window_bounds = array<i64: 128, 128>}, {transform_indices = @transform_1, window_bounds = array<i64: 128, 128>}, {transform_indices = @transform_2, window_bounds = array<i64: 128, 128>}, {transform_indices = @transform_3, window_bounds = array<i64: 128, 128>}, {transform_indices = @transform_4, window_bounds = array<i64: 128, 128>}, {transform_indices = @transform_5, window_bounds = array<i64: 128, 128>}, {transform_indices = @transform_6, window_bounds = array<i64: 1, 128>}, {transform_indices = @transform_7, window_bounds = array<i64: 128, 128>}, {transform_indices = @transform_8, window_bounds = array<i64: 128, 128>}, {transform_indices = @transform_9, window_bounds = array<i64: 1, 128>}, {transform_indices = @transform_10, window_bounds = array<i64: 1, 128>}]} {
    %c0 = arith.constant 0 : index
    %0 = memref.load %arg2[%c0] : memref<4xf32, #tpu.memory_space<smem>>
    %c1 = arith.constant 1 : index
    %1 = memref.load %arg2[%c1] : memref<4xf32, #tpu.memory_space<smem>>
    %c2 = arith.constant 2 : index
    %2 = memref.load %arg2[%c2] : memref<4xf32, #tpu.memory_space<smem>>
    %c3 = arith.constant 3 : index
    %3 = memref.load %arg2[%c3] : memref<4xf32, #tpu.memory_space<smem>>
    %c0_0 = arith.constant 0 : index
    %c0_1 = arith.constant 0 : index
    %4 = vector.load %arg5[%c0_0, %c0_1] : memref<128x128xf32, #tpu.memory_space<vmem>>, vector<128x128xf32>
    %c0_2 = arith.constant 0 : index
    %c0_3 = arith.constant 0 : index
    %5 = vector.load %arg6[%c0_2, %c0_3] : memref<128x128xf32, #tpu.memory_space<vmem>>, vector<128x128xf32>
    %c0_4 = arith.constant 0 : index
    %c0_5 = arith.constant 0 : index
    %6 = vector.load %arg3[%c0_4, %c0_5] : memref<128x128xf32, #tpu.memory_space<vmem>>, vector<128x128xf32>
    %c0_6 = arith.constant 0 : index
    %c0_7 = arith.constant 0 : index
    %7 = vector.load %arg4[%c0_6, %c0_7] : memref<128x128xf32, #tpu.memory_space<vmem>>, vector<128x128xf32>
    %8 = tpu.transpose %7, [1, 0] : vector<128x128xf32> -> vector<128x128xf32>
    %9 = arith.addf %6, %8 : vector<128x128xf32>
    %cst = arith.constant 5.000000e-01 : f32
    %10 = vector.broadcast %cst : f32 to vector<128x128xf32>
    %11 = arith.mulf %10, %9 : vector<128x128xf32>
    %12 = vector.broadcast %2 : f32 to vector<128x128xf32>
    %13 = arith.subf %11, %12 : vector<128x128xf32>
    %14 = tpu.transpose %13, [1, 0] : vector<128x128xf32> -> vector<128x128xf32>
    %c0_8 = arith.constant 0 : index
    %c0_9 = arith.constant 0 : index
    %15 = vector.load %arg7[%c0_8, %c0_9] : memref<128x128xf32, #tpu.memory_space<vmem>>, vector<128x128xf32>
    %16 = vector.broadcast %0 : f32 to vector<128x128xf32>
    %17 = arith.mulf %16, %15 : vector<128x128xf32>
    %18 = arith.mulf %4, %13 : vector<128x128xf32>
    %19 = arith.mulf %17, %18 : vector<128x128xf32>
    %20 = arith.addf %15, %19 : vector<128x128xf32>
    %21 = math.absf %20 : vector<128x128xf32>
    %22 = vector.broadcast %1 : f32 to vector<128x128xf32>
    %23 = arith.subf %21, %22 : vector<128x128xf32>
    %cst_10 = arith.constant 0.000000e+00 : f32
    %24 = vector.broadcast %cst_10 : f32 to vector<128x128xf32>
    %25 = arith.maximumf %23, %24 : vector<128x128xf32>
    %cst_11 = arith.constant 1.000000e+00 : f32
    %26 = vector.broadcast %cst_11 : f32 to vector<128x128xf32>
    %27 = arith.minimumf %25, %26 : vector<128x128xf32>
    %c0_12 = arith.constant 0 : index
    %c0_13 = arith.constant 0 : index
    %28 = vector.load %arg8[%c0_12, %c0_13] : memref<128x128xf32, #tpu.memory_space<vmem>>, vector<128x128xf32>
    %29 = vector.broadcast %0 : f32 to vector<128x128xf32>
    %30 = arith.mulf %29, %28 : vector<128x128xf32>
    %31 = arith.mulf %5, %14 : vector<128x128xf32>
    %32 = arith.mulf %30, %31 : vector<128x128xf32>
    %33 = arith.addf %28, %32 : vector<128x128xf32>
    %34 = math.absf %33 : vector<128x128xf32>
    %35 = vector.broadcast %1 : f32 to vector<128x128xf32>
    %36 = arith.subf %34, %35 : vector<128x128xf32>
    %cst_14 = arith.constant 0.000000e+00 : f32
    %37 = vector.broadcast %cst_14 : f32 to vector<128x128xf32>
    %38 = arith.maximumf %36, %37 : vector<128x128xf32>
    %cst_15 = arith.constant 1.000000e+00 : f32
    %39 = vector.broadcast %cst_15 : f32 to vector<128x128xf32>
    %40 = arith.minimumf %38, %39 : vector<128x128xf32>
    %41 = arith.mulf %27, %27 : vector<128x128xf32>
    %42 = arith.mulf %40, %40 : vector<128x128xf32>
    %43 = tpu.transpose %42, [1, 0] : vector<128x128xf32> -> vector<128x128xf32>
    %44 = arith.addf %41, %43 : vector<128x128xf32>
    %cst_16 = arith.constant 5.000000e-01 : f32
    %45 = vector.broadcast %cst_16 : f32 to vector<128x128xf32>
    %46 = arith.mulf %45, %44 : vector<128x128xf32>
    %47 = arith.mulf %46, %4 : vector<128x128xf32>
    %c0_17 = arith.constant 0 : index
    %c0_18 = arith.constant 0 : index
    %48 = vector.load %arg10[%c0_17, %c0_18] : memref<128x128xf32, #tpu.memory_space<vmem>>, vector<128x128xf32>
    tpu.vector_store %arg10[%c0_17, %c0_18], %27 {strides = array<i32>} : memref<128x128xf32, #tpu.memory_space<vmem>>, vector<128x128xf32>,
    %c0_19 = arith.constant 0 : index
    %c0_20 = arith.constant 0 : index
    %49 = vector.load %arg11[%c0_19, %c0_20] : memref<128x128xf32, #tpu.memory_space<vmem>>, vector<128x128xf32>
    tpu.vector_store %arg11[%c0_19, %c0_20], %47 {strides = array<i32>} : memref<128x128xf32, #tpu.memory_space<vmem>>, vector<128x128xf32>,
    %c0_i32 = arith.constant 0 : i32
    %50 = arith.cmpi eq, %arg1, %c0_i32 : i32
    %51 = arith.extui %50 : i1 to i32
    %c0_i32_21 = arith.constant 0 : i32
    %52 = arith.cmpi ne, %51, %c0_i32_21 : i32
    scf.if %52 {
      %cst_30 = arith.constant 0.000000e+00 : f32
      %69 = vector.broadcast %cst_30 : f32 to vector<1x128xf32>
      %c0_31 = arith.constant 0 : index
      %c0_32 = arith.constant 0 : index
      %70 = vector.load %arg12[%c0_31, %c0_32] : memref<1x128xf32, #tpu.memory_space<vmem>>, vector<1x128xf32>
      tpu.vector_store %arg12[%c0_31, %c0_32], %69 {strides = array<i32>} : memref<1x128xf32, #tpu.memory_space<vmem>>, vector<1x128xf32>,
      %c0_33 = arith.constant 0 : index
      %c0_34 = arith.constant 0 : index
      %71 = vector.load %arg9[%c0_33, %c0_34] : memref<1x128xf32, #tpu.memory_space<vmem>>, vector<1x128xf32>
      %c0_35 = arith.constant 0 : index
      %c0_36 = arith.constant 0 : index
      %72 = vector.load %arg13[%c0_35, %c0_36] : memref<1x128xf32, #tpu.memory_space<vmem>>, vector<1x128xf32>
      tpu.vector_store %arg13[%c0_35, %c0_36], %71 {strides = array<i32>} : memref<1x128xf32, #tpu.memory_space<vmem>>, vector<1x128xf32>,
    } else {
    }
    %53 = tpu.iota {dimensions = array<i32: 0>} : vector<128x128xi32>
    %c128_i32 = arith.constant 128 : i32
    %54 = arith.muli %arg1, %c128_i32 : i32
    %55 = vector.broadcast %54 : i32 to vector<128x128xi32>
    %56 = arith.addi %53, %55 : vector<128x128xi32>
    %c16_i32 = arith.constant 16 : i32
    %57 = vector.broadcast %c16_i32 : i32 to vector<128x128xi32>
    %58 = arith.cmpi slt, %56, %57 : vector<128x128xi32>
    %cst_22 = arith.constant 0.000000e+00 : f32
    %59 = vector.broadcast %cst_22 : f32 to vector<128x128xf32>
    %60 = arith.select %58, %47, %59 : vector<128x128xi1>, vector<128x128xf32>
    %c0_23 = arith.constant 0 : index
    %c0_24 = arith.constant 0 : index
    %61 = vector.load %arg12[%c0_23, %c0_24] : memref<1x128xf32, #tpu.memory_space<vmem>>, vector<1x128xf32>
    %cst_25 = arith.constant dense<0.000000e+00> : vector<128xf32>
    %62 = vector.multi_reduction <add>, %60, %cst_25 [0] : vector<128x128xf32> to vector<128xf32>
    %63 = vector.shape_cast %62 : vector<128xf32> to vector<1x128xf32>
    %64 = arith.addf %61, %63 : vector<1x128xf32>
    %c0_26 = arith.constant 0 : index
    %c0_27 = arith.constant 0 : index
    %65 = vector.load %arg12[%c0_26, %c0_27] : memref<1x128xf32, #tpu.memory_space<vmem>>, vector<1x128xf32>
    tpu.vector_store %arg12[%c0_26, %c0_27], %64 {strides = array<i32>} : memref<1x128xf32, #tpu.memory_space<vmem>>, vector<1x128xf32>,
    %c0_i32_28 = arith.constant 0 : i32
    %66 = arith.cmpi eq, %arg1, %c0_i32_28 : i32
    %67 = arith.extui %66 : i1 to i32
    %c0_i32_29 = arith.constant 0 : i32
    %68 = arith.cmpi ne, %67, %c0_i32_29 : i32
    scf.if %68 {
      %c0_30 = arith.constant 0 : index
      %c0_31 = arith.constant 0 : index
      %69 = vector.load %arg9[%c0_30, %c0_31] : memref<1x128xf32, #tpu.memory_space<vmem>>, vector<1x128xf32>
      %c0_32 = arith.constant 0 : index
      %c0_33 = arith.constant 0 : index
      %70 = vector.load %arg12[%c0_32, %c0_33] : memref<1x128xf32, #tpu.memory_space<vmem>>, vector<1x128xf32>
      %cst_34 = arith.constant 1.000000e+00 : f32
      %71 = vector.broadcast %cst_34 : f32 to vector<1x128xf32>
      %72 = arith.subf %70, %71 : vector<1x128xf32>
      %cst_35 = arith.constant 0.000000e+00 : f32
      %73 = vector.broadcast %cst_35 : f32 to vector<1x128xf32>
      %74 = arith.maximumf %72, %73 : vector<1x128xf32>
      %75 = vector.broadcast %3 : f32 to vector<1x128xf32>
      %76 = arith.mulf %75, %74 : vector<1x128xf32>
      %77 = arith.addf %69, %76 : vector<1x128xf32>
      %c0_36 = arith.constant 0 : index
      %c0_37 = arith.constant 0 : index
      %78 = vector.load %arg13[%c0_36, %c0_37] : memref<1x128xf32, #tpu.memory_space<vmem>>, vector<1x128xf32>
      tpu.vector_store %arg13[%c0_36, %c0_37], %77 {strides = array<i32>} : memref<1x128xf32, #tpu.memory_space<vmem>>, vector<1x128xf32>,
    } else {
    }
    return
  }
  func.func @transform_0(%arg0: i32, %arg1: i32, %arg2: memref<4xf32, #tpu.memory_space<smem>>) -> (i32, i32) {
    %c0_i32 = arith.constant 0 : i32
    return %arg1, %arg0 : i32, i32
  }
  func.func @transform_1(%arg0: i32, %arg1: i32, %arg2: memref<4xf32, #tpu.memory_space<smem>>) -> (i32, i32) {
    %c0_i32 = arith.constant 0 : i32
    return %arg0, %arg1 : i32, i32
  }
  func.func @transform_2(%arg0: i32, %arg1: i32, %arg2: memref<4xf32, #tpu.memory_space<smem>>) -> (i32, i32) {
    %c0_i32 = arith.constant 0 : i32
    return %arg1, %arg0 : i32, i32
  }
  func.func @transform_3(%arg0: i32, %arg1: i32, %arg2: memref<4xf32, #tpu.memory_space<smem>>) -> (i32, i32) {
    %c0_i32 = arith.constant 0 : i32
    return %arg0, %arg1 : i32, i32
  }
  func.func @transform_4(%arg0: i32, %arg1: i32, %arg2: memref<4xf32, #tpu.memory_space<smem>>) -> (i32, i32) {
    %c0_i32 = arith.constant 0 : i32
    return %arg1, %arg0 : i32, i32
  }
  func.func @transform_5(%arg0: i32, %arg1: i32, %arg2: memref<4xf32, #tpu.memory_space<smem>>) -> (i32, i32) {
    %c0_i32 = arith.constant 0 : i32
    return %arg0, %arg1 : i32, i32
  }
  func.func @transform_6(%arg0: i32, %arg1: i32, %arg2: memref<4xf32, #tpu.memory_space<smem>>) -> (i32, i32) {
    %c0_i32 = arith.constant 0 : i32
    %c0_i32_0 = arith.constant 0 : i32
    return %c0_i32, %arg0 : i32, i32
  }
  func.func @transform_7(%arg0: i32, %arg1: i32, %arg2: memref<4xf32, #tpu.memory_space<smem>>) -> (i32, i32) {
    %c0_i32 = arith.constant 0 : i32
    return %arg1, %arg0 : i32, i32
  }
  func.func @transform_8(%arg0: i32, %arg1: i32, %arg2: memref<4xf32, #tpu.memory_space<smem>>) -> (i32, i32) {
    %c0_i32 = arith.constant 0 : i32
    return %arg1, %arg0 : i32, i32
  }
  func.func @transform_9(%arg0: i32, %arg1: i32, %arg2: memref<4xf32, #tpu.memory_space<smem>>) -> (i32, i32) {
    %c0_i32 = arith.constant 0 : i32
    %c0_i32_0 = arith.constant 0 : i32
    return %c0_i32, %arg0 : i32, i32
  }
  func.func @transform_10(%arg0: i32, %arg1: i32, %arg2: memref<4xf32, #tpu.memory_space<smem>>) -> (i32, i32) {
    %c0_i32 = arith.constant 0 : i32
    %c0_i32_0 = arith.constant 0 : i32
    return %c0_i32, %arg0 : i32, i32
  }
}

</mosaic_0001>

<bundles_post_ra>
// kernel: ppcell_forward.1
= control target key start
LH: loop header
LB: loop body
LE: loop exit
PB: predicated region body
PF: predicated region fallthrough
CT: control target
= control target key end

     0   :  { %s1532_s0 = inlined_call_operand.vmem [shape: f32[4], index: 0, kind: input, shape index: {}]   ;;  %s1533_s1 = inlined_call_operand.vmem [shape: f32[128,128], index: 1, kind: input, shape index: {}, may-alias: {1,2}]   ;;  %s1534_s2 = inlined_call_operand.vmem [shape: f32[128,128], index: 2, kind: input, shape index: {}, may-alias: {1,2}]   ;;  %s1535_s3 = inlined_call_operand.vmem [shape: f32[128,128], index: 3, kind: input, shape index: {}, may-alias: {3,4}]   ;;  %s1536_s4 = inlined_call_operand.vmem [shape: f32[128,128], index: 4, kind: input, shape index: {}, may-alias: {3,4}]   ;;  %s1537_s5 = inlined_call_operand.vmem [shape: f32[128,128], index: 5, kind: input, shape index: {}, may-alias: {5,6}]   ;;  %s1538_s6 = inlined_call_operand.vmem [shape: f32[128,128], index: 6, kind: input, shape index: {}, may-alias: {5,6}]   ;;  %s1539_s7 = inlined_call_operand.vmem [shape: f32[1,128], index: 7, kind: input, shape index: {}]   ;;  %s1540_s8 = inlined_call_operand.vmem [shape: f32[128,128], index: 8, kind: output, shape index: {0}]   ;;  %s1541_s9 = inlined_call_operand.vmem [shape: f32[128,128], index: 9, kind: output, shape index: {1}]   ;;  %s1542_s10 = inlined_call_operand.vmem [shape: f32[1,128], index: 10, kind: output, shape index: {2}]   ;;  %s1543_s11 = inlined_call_operand.hbm [shape: f32[1,128], index: 11, kind: output, shape index: {3}]  }
   0x1   :  { %s17_s19 = sshll.u32 %s1532_s0, 4  ;;  %s18_s19 = int_to_ptr.vmem [resolvable:$true] %s17_s19 }
   0x2   :  { %s795_s20 = scalar_lea.vmem %s18_s19, 16  ;;  %p800_p1 = scmp.lt.s32.totalorder %s18_s19, %s18_s19 }
   0x3   :  { %p796_p0 = scmp.ne.s32.totalorder %s18_s19, %s795_s20  ;;  %p801_p2 = scmp.lt.s32.totalorder %s795_s20, %s795_s20 }
   0x5   :  { %p802_p3 = por %p801_p2, %p800_p1 }
   0x7   :  { %p803_p4 = pnand %p802_p3, %p796_p0 }
   0x9   :  { %806 = shalt.err (!%p803_p4)  }
   0xa   :  { %s831_s21 = smov [#allocation3]  }
   0xb   :  { %20 = dma.vmem_to_smem %s18_s19, 16, %s831_s21, [#allocation2] }
   0xc   :  { %827 = dma.done.wait [#allocation2], 16 }
   0xd   :  { %828 = vsyncadd [#allocation2], 4294967280 }
   0xe   :  { %22 = sfence }
   0xf   :  { %v90_v0 = vld [vmem:[%s1534_s2] sm:$0xff]  ;;  %v91_v1 = vld [vmem:[%s1534_s2 + $0x8] sm:$0xff]  ;;  %v92_v2 = vld [vmem:[%s1534_s2 + $0x10] sm:$0xff] }
  0x10   :  { %106 = vxpose.xlu0.b32.start [1/16] %v90_v0, 128 }
  0x14   :  { %107 = vxpose.xlu0.b32.cont [2/16] %v91_v1, 128 }
  0x15   :  { %23 = vsyncpa [#allocation5], 0  ;;  %v93_v3 = vld [vmem:[%s1534_s2 + $0x18] sm:$0xff]  ;;  %v94_v4 = vld [vmem:[%s1534_s2 + $0x20] sm:$0xff]  ;;  %s789_s14 = sld [smem:[#allocation3 + $0x2]] }
  0x16   :  { %v95_v5 = vld [vmem:[%s1534_s2 + $0x28] sm:$0xff]  ;;  %v96_v6 = vld [vmem:[%s1534_s2 + $0x30] sm:$0xff]  ;;  %v97_v7 = vld [vmem:[%s1534_s2 + $0x38] sm:$0xff]  ;;  %s38_s15 = sld [smem:[#allocation3]] }
  0x17   :  { %v98_v8 = vld [vmem:[%s1534_s2 + $0x40] sm:$0xff]  ;;  %v99_v9 = vld [vmem:[%s1534_s2 + $0x48] sm:$0xff]  ;;  %v100_v10 = vld [vmem:[%s1534_s2 + $0x50] sm:$0xff]  ;;  %s788_s23 = sld [smem:[#allocation3 + $0x1]] }
  0x18   :  { %108 = vxpose.xlu0.b32.cont [3/16] %v92_v2, 128  ;;  %v101_v11 = vld [vmem:[%s1534_s2 + $0x58] sm:$0xff]  ;;  %v102_v12 = vld [vmem:[%s1534_s2 + $0x60] sm:$0xff]  ;;  %v103_v13 = vld [vmem:[%s1534_s2 + $0x68] sm:$0xff]  ;;  %s790_s22 = sld [smem:[#allocation3 + $0x3]] }
  0x19   :  { %v104_v14 = vld [vmem:[%s1534_s2 + $0x70] sm:$0xff]  ;;  %v105_v15 = vld [vmem:[%s1534_s2 + $0x78] sm:$0xff]  ;;  %v74_v16 = vld [vmem:[%s1533_s1] sm:$0xff] }
  0x1a   :  { %v75_v19 = vld [vmem:[%s1533_s1 + $0x8] sm:$0xff]  ;;  %v219_v21 = vld [vmem:[%s1537_s5] sm:$0xff]  ;;  %v76_v29 = vld [vmem:[%s1533_s1 + $0x10] sm:$0xff] }
  0x1b   :  { %v951_v20 = vstv %s789_s14  ;;  %v961_v25 = vld [vmem:[%s1535_s3] sm:$0xff]  ;;  %v220_v30 = vld [vmem:[%s1537_s5 + $0x8] sm:$0xff]  ;;  %v221_v39 = vld [vmem:[%s1537_s5 + $0x10] sm:$0xff] }
  0x1c   :  { %109 = vxpose.xlu0.b32.cont [4/16] %v93_v3, 128  ;;  %v956_v22 = vstv %s38_s15  ;;  %v975_v34 = vld [vmem:[%s1535_s3 + $0x8] sm:$0xff]  ;;  %v77_v40 = vld [vmem:[%s1533_s1 + $0x18] sm:$0xff]  ;;  %v989_v45 = vld [vmem:[%s1535_s3 + $0x10] sm:$0xff] }
  0x1d   :  { %v236_v28 = vmul.f32 %v956_v22, %v219_v21  ;;  %v237_v38 = vmul.f32 %v956_v22, %v220_v30  ;;  %v238_v46 = vmul.f32 %v956_v22, %v221_v39  ;;  %v992_v47 = vstv %s788_s23  ;;  %v222_v51 = vld [vmem:[%s1537_s5 + $0x18] sm:$0xff]  ;;  %v78_v53 = vld [vmem:[%s1533_s1 + $0x20] sm:$0xff]  ;;  %v79_v1 = vld [vmem:[%s1533_s1 + $0x28] sm:$0xff] }
  0x1e   :  { %v1006_v59 = vld [vmem:[%s1535_s3 + $0x18] sm:$0xff]  ;;  %v239_v60 = vmul.f32 %v956_v22, %v222_v51  ;;  %v223_v2 = vld [vmem:[%s1537_s5 + $0x20] sm:$0xff] }
  0x20   :  { %110 = vxpose.xlu0.b32.cont [5/16] %v94_v4, 128 }
  0x24   :  { %111 = vxpose.xlu0.b32.cont [6/16] %v95_v5, 128 }
  0x28   :  { %112 = vxpose.xlu0.b32.cont [7/16] %v96_v6, 128 }
  0x2c   :  { %113 = vxpose.xlu0.b32.cont [8/16] %v97_v7, 128 }
  0x30   :  { %114 = vxpose.xlu0.b32.cont [9/16] %v98_v8, 128 }
  0x34   :  { %115 = vxpose.xlu0.b32.cont [10/16] %v99_v9, 128  ;;  %v1022_v9 = vld [vmem:[%s1535_s3 + $0x20] sm:$0xff] }
  0x38   :  { %116 = vxpose.xlu0.b32.cont [11/16] %v100_v10, 128 }
  0x3c   :  { %117 = vxpose.xlu0.b32.cont [12/16] %v101_v11, 128 }
  0x40   :  { %118 = vxpose.xlu0.b32.cont [13/16] %v102_v12, 128 }
  0x44   :  { %119 = vxpose.xlu0.b32.cont [14/16] %v103_v13, 128 }
  0x48   :  { %120 = vxpose.xlu0.b32.cont [15/16] %v104_v14, 128  ;;  %v240_v14 = vmul.f32 %v956_v22, %v223_v2 }
  0x4c   :  { %121 = vxpose.xlu0.b32.end [16/16] %v105_v15, 128  ;;  %v224_v15 = vld [vmem:[%s1537_s5 + $0x28] sm:$0xff] }
  0x8c   :  { %v122_v17 = vpop.trf.xlu0 }
  0x8d   :  { %v138_v18 = vadd.f32 %v122_v17, %v74_v16  ;;  %v80_v16 = vld [vmem:[%s1533_s1 + $0x30] sm:$0xff] }
  0x8f   :  { %v154_v23 = vmul.f32 0.5, %v138_v18 }
  0x90   :  { %v123_v24 = vpop.trf.xlu0 }
  0x91   :  { %v139_v26 = vadd.f32 %v123_v24, %v75_v19  ;;  %v171_v27 = vsub.f32 %v154_v23, %v951_v20 }
  0x93   :  { %v155_v31 = vmul.f32 0.5, %v139_v26  ;;  %187 = vxpose.xlu1.b32.start [1/16] %v171_v27, 128  ;;  %v252_v32 = vmul.f32 %v171_v27, %v961_v25  ;;  %v1041_v26 = vld [vmem:[%s1535_s3 + $0x28] sm:$0xff]  ;;  %v241_v27 = vmul.f32 %v956_v22, %v224_v15 }
  0x94   :  { %v124_v33 = vpop.trf.xlu0 }
  0x95   :  { %v268_v35 = vmul.f32 %v252_v32, %v236_v28  ;;  %v140_v36 = vadd.f32 %v124_v33, %v76_v29  ;;  %v172_v37 = vsub.f32 %v155_v31, %v951_v20  ;;  %v225_v33 = vld [vmem:[%s1537_s5 + $0x30] sm:$0xff] }
  0x97   :  { %v284_v41 = vadd.f32 %v268_v35, %v219_v21  ;;  %v156_v42 = vmul.f32 0.5, %v140_v36  ;;  %v253_v43 = vmul.f32 %v172_v37, %v975_v34  ;;  %188 = vxpose.xlu1.b32.cont [2/16] %v172_v37, 128  ;;  %v81_v36 = vld [vmem:[%s1533_s1 + $0x38] sm:$0xff] }
  0x98   :  { %v125_v44 = vpop.trf.xlu0 }
  0x99   :  { %v269_v48 = vmul.f32 %v253_v43, %v237_v38  ;;  %v141_v49 = vadd.f32 %v125_v44, %v77_v40  ;;  %v173_v50 = vsub.f32 %v156_v42, %v951_v20  ;;  %v300_v52 = vand.u32 2147483647, %v284_v41  ;;  %v1063_v43 = vld [vmem:[%s1535_s3 + $0x30] sm:$0xff] }
  0x9a   :  { %v242_v44 = vmul.f32 %v956_v22, %v225_v33 }
  0x9b   :  { %v285_v54 = vadd.f32 %v269_v48, %v220_v30  ;;  %v157_v55 = vmul.f32 0.5, %v141_v49  ;;  %v254_v56 = vmul.f32 %v173_v50, %v989_v45  ;;  %189 = vxpose.xlu1.b32.cont [3/16] %v173_v50, 128  ;;  %v317_v57 = vsub.f32 %v300_v52, %v992_v47  ;;  %v82_v52 = vld [vmem:[%s1533_s1 + $0x40] sm:$0xff] }
  0x9c   :  { %v126_v58 = vpop.trf.xlu0 }
  0x9d   :  { %v270_v61 = vmul.f32 %v254_v56, %v238_v46  ;;  %v142_v62 = vadd.f32 %v126_v58, %v78_v53  ;;  %v174_v63 = vsub.f32 %v157_v55, %v951_v20  ;;  %v333_v0 = vmax.f32 %v317_v57, 0.0  ;;  %v226_v53 = vld [vmem:[%s1537_s5 + $0x38] sm:$0xff] }
  0x9e   :  { %v301_v3 = vand.u32 2147483647, %v285_v54 }
  0x9f   :  { %v286_v4 = vadd.f32 %v270_v61, %v221_v39  ;;  %v158_v5 = vmul.f32 0.5, %v142_v62  ;;  %v255_v6 = vmul.f32 %v174_v63, %v1006_v59  ;;  %190 = vxpose.xlu1.b32.cont [4/16] %v174_v63, 128  ;;  %v1017_v7 = vmin.f32 %v333_v0, 1.0  ;;  %v1085_v61 = vld [vmem:[%s1535_s3 + $0x38] sm:$0xff] }
  0xa0   :  { %v127_v8 = vpop.trf.xlu0  ;;  %v318_v10 = vsub.f32 %v301_v3, %v992_v47  ;;  %v227_v3 = vld [vmem:[%s1537_s5 + $0x40] sm:$0xff] }
  0xa1   :  { %v271_v11 = vmul.f32 %v255_v6, %v239_v60  ;;  %v143_v12 = vadd.f32 %v127_v8, %v79_v1  ;;  %v175_v13 = vsub.f32 %v158_v5, %v951_v20  ;;  %621 = vst [vmem:[%s1540_s8] sm:$0xff] %v1017_v7  ;;  %v302_v18 = vand.u32 2147483647, %v286_v4  ;;  %v83_v4 = vld [vmem:[%s1533_s1 + $0x48] sm:$0xff] }
  0xa2   :  { %v334_v17 = vmax.f32 %v318_v10, 0.0 }
  0xa3   :  { %v287_v19 = vadd.f32 %v271_v11, %v222_v51  ;;  %v159_v21 = vmul.f32 0.5, %v143_v12  ;;  %v256_v23 = vmul.f32 %v175_v13, %v1022_v9  ;;  %191 = vxpose.xlu1.b32.cont [5/16] %v175_v13, 128  ;;  %v319_v29 = vsub.f32 %v302_v18, %v992_v47  ;;  %v1104_v13 = vld [vmem:[%s1535_s3 + $0x40] sm:$0xff] }
  0xa4   :  { %v128_v24 = vpop.trf.xlu0  ;;  %v1044_v28 = vmin.f32 %v334_v17, 1.0 }
  0xa5   :  { %v272_v30 = vmul.f32 %v256_v23, %v240_v14  ;;  %v144_v31 = vadd.f32 %v128_v24, %v80_v16  ;;  %v176_v32 = vsub.f32 %v159_v21, %v951_v20  ;;  %v303_v35 = vand.u32 2147483647, %v287_v19  ;;  %v228_v21 = vld [vmem:[%s1537_s5 + $0x48] sm:$0xff]  ;;  %v84_v24 = vld [vmem:[%s1533_s1 + $0x50] sm:$0xff] }
  0xa6   :  { %622 = vst [vmem:[%s1540_s8 + $0x8] sm:$0xff] %v1044_v28  ;;  %v335_v37 = vmax.f32 %v319_v29, 0.0  ;;  %v244_v14 = vmul.f32 %v956_v22, %v227_v3 }
  0xa7   :  { %v288_v38 = vadd.f32 %v272_v30, %v223_v2  ;;  %v160_v39 = vmul.f32 0.5, %v144_v31  ;;  %v257_v40 = vmul.f32 %v176_v32, %v1041_v26  ;;  %192 = vxpose.xlu1.b32.cont [6/16] %v176_v32, 128  ;;  %v320_v41 = vsub.f32 %v303_v35, %v992_v47  ;;  %v1126_v35 = vld [vmem:[%s1535_s3 + $0x48] sm:$0xff] }
  0xa8   :  { %v129_v42 = vpop.trf.xlu0  ;;  %v1066_v46 = vmin.f32 %v335_v37, 1.0  ;;  %v243_v2 = vmul.f32 %v956_v22, %v226_v53 }
  0xa9   :  { %v273_v48 = vmul.f32 %v257_v40, %v241_v27  ;;  %v145_v49 = vadd.f32 %v129_v42, %v81_v36  ;;  %v177_v50 = vsub.f32 %v160_v39, %v951_v20  ;;  %v336_v51 = vmax.f32 %v320_v41, 0.0  ;;  %v85_v42 = vld [vmem:[%s1533_s1 + $0x58] sm:$0xff] }
  0xaa   :  { %623 = vst [vmem:[%s1540_s8 + $0x10] sm:$0xff] %v1066_v46  ;;  %v304_v54 = vand.u32 2147483647, %v288_v38  ;;  %v245_v36 = vmul.f32 %v956_v22, %v228_v21 }
  0xab   :  { %v289_v55 = vadd.f32 %v273_v48, %v224_v15  ;;  %v161_v56 = vmul.f32 0.5, %v145_v49  ;;  %v258_v57 = vmul.f32 %v177_v50, %v1063_v43  ;;  %193 = vxpose.xlu1.b32.cont [7/16] %v177_v50, 128  ;;  %v1080_v58 = vmin.f32 %v336_v51, 1.0 }
  0xac   :  { %v130_v60 = vpop.trf.xlu0  ;;  %v321_v62 = vsub.f32 %v304_v54, %v992_v47  ;;  %v1148_v54 = vld [vmem:[%s1535_s3 + $0x50] sm:$0xff] }
  0xad   :  { %v274_v63 = vmul.f32 %v258_v57, %v242_v44  ;;  %v146_v0 = vadd.f32 %v130_v60, %v82_v52  ;;  %v178_v1 = vsub.f32 %v161_v56, %v951_v20  ;;  %624 = vst [vmem:[%s1540_s8 + $0x18] sm:$0xff] %v1080_v58  ;;  %v305_v6 = vand.u32 2147483647, %v289_v55  ;;  %v229_v44 = vld [vmem:[%s1537_s5 + $0x50] sm:$0xff] }
  0xae   :  { %v337_v5 = vmax.f32 %v321_v62, 0.0  ;;  %v246_v62 = vmul.f32 %v956_v22, %v229_v44 }
  0xaf   :  { %v290_v8 = vadd.f32 %v274_v63, %v225_v33  ;;  %v162_v10 = vmul.f32 0.5, %v146_v0  ;;  %v259_v11 = vmul.f32 %v178_v1, %v1085_v61  ;;  %194 = vxpose.xlu1.b32.cont [8/16] %v178_v1, 128  ;;  %v322_v16 = vsub.f32 %v305_v6, %v992_v47  ;;  %v230_v63 = vld [vmem:[%s1537_s5 + $0x58] sm:$0xff]  ;;  %v86_v0 = vld [vmem:[%s1533_s1 + $0x60] sm:$0xff] }
  0xb0   :  { %v131_v12 = vpop.trf.xlu0  ;;  %v1107_v15 = vmin.f32 %v337_v5, 1.0 }
  0xb1   :  { %v275_v17 = vmul.f32 %v259_v11, %v243_v2  ;;  %v147_v18 = vadd.f32 %v131_v12, %v83_v4  ;;  %v179_v19 = vsub.f32 %v162_v10, %v951_v20  ;;  %v306_v23 = vand.u32 2147483647, %v290_v8  ;;  %v1167_v8 = vld [vmem:[%s1535_s3 + $0x58] sm:$0xff] }
  0xb2   :  { %625 = vst [vmem:[%s1540_s8 + $0x20] sm:$0xff] %v1107_v15  ;;  %v338_v27 = vmax.f32 %v322_v16, 0.0  ;;  %v247_v10 = vmul.f32 %v956_v22, %v230_v63 }
  0xb3   :  { %v291_v29 = vadd.f32 %v275_v17, %v226_v53  ;;  %v163_v30 = vmul.f32 0.5, %v147_v18  ;;  %v260_v31 = vmul.f32 %v179_v19, %v1104_v13  ;;  %195 = vxpose.xlu1.b32.cont [9/16] %v179_v19, 128  ;;  %v323_v32 = vsub.f32 %v306_v23, %v992_v47  ;;  %v231_v18 = vld [vmem:[%s1537_s5 + $0x60] sm:$0xff] }
  0xb4   :  { %v132_v33 = vpop.trf.xlu0  ;;  %v1129_v37 = vmin.f32 %v338_v27, 1.0 }
  0xb5   :  { %v276_v38 = vmul.f32 %v260_v31, %v244_v14  ;;  %v148_v39 = vadd.f32 %v132_v33, %v84_v24  ;;  %v180_v40 = vsub.f32 %v163_v30, %v951_v20  ;;  %v339_v41 = vmax.f32 %v323_v32, 0.0  ;;  %v1189_v32 = vld [vmem:[%s1535_s3 + $0x60] sm:$0xff] }
  0xb6   :  { %626 = vst [vmem:[%s1540_s8 + $0x28] sm:$0xff] %v1129_v37  ;;  %v307_v48 = vand.u32 2147483647, %v291_v29  ;;  %v248_v33 = vmul.f32 %v956_v22, %v231_v18 }
  0xb7   :  { %v292_v49 = vadd.f32 %v276_v38, %v227_v3  ;;  %v164_v50 = vmul.f32 0.5, %v148_v39  ;;  %v261_v51 = vmul.f32 %v180_v40, %v1126_v35  ;;  %196 = vxpose.xlu1.b32.cont [10/16] %v180_v40, 128  ;;  %v1143_v52 = vmin.f32 %v339_v41, 1.0 }
  0xb8   :  { %v133_v53 = vpop.trf.xlu0  ;;  %v324_v55 = vsub.f32 %v307_v48, %v992_v47 }
  0xb9   :  { %v277_v56 = vmul.f32 %v261_v51, %v245_v36  ;;  %v149_v57 = vadd.f32 %v133_v53, %v85_v42  ;;  %v181_v60 = vsub.f32 %v164_v50, %v951_v20  ;;  %627 = vst [vmem:[%s1540_s8 + $0x30] sm:$0xff] %v1143_v52  ;;  %v308_v2 = vand.u32 2147483647, %v292_v49  ;;  %v88_v42 = vld [vmem:[%s1533_s1 + $0x70] sm:$0xff] }
  0xba   :  { %v340_v1 = vmax.f32 %v324_v55, 0.0 }
  0xbb   :  { %v293_v3 = vadd.f32 %v277_v56, %v228_v21  ;;  %v165_v4 = vmul.f32 0.5, %v149_v57  ;;  %v262_v5 = vmul.f32 %v181_v60, %v1148_v54  ;;  %197 = vxpose.xlu1.b32.cont [11/16] %v181_v60, 128  ;;  %v325_v12 = vsub.f32 %v308_v2, %v992_v47  ;;  %v87_v21 = vld [vmem:[%s1533_s1 + $0x68] sm:$0xff]  ;;  %v89_v2 = vld [vmem:[%s1533_s1 + $0x78] sm:$0xff] }
  0xbc   :  { %v134_v6 = vpop.trf.xlu0  ;;  %v1170_v11 = vmin.f32 %v340_v1, 1.0  ;;  %v1211_v56 = vld [vmem:[%s1535_s3 + $0x68] sm:$0xff]  ;;  %v233_v1 = vld [vmem:[%s1537_s5 + $0x70] sm:$0xff] }
  0xbd   :  { %v278_v14 = vmul.f32 %v262_v5, %v246_v62  ;;  %v150_v16 = vadd.f32 %v134_v6, %v86_v0  ;;  %v182_v17 = vsub.f32 %v165_v4, %v951_v20  ;;  %v309_v19 = vand.u32 2147483647, %v293_v3 }
  0xbe   :  { %628 = vst [vmem:[%s1540_s8 + $0x38] sm:$0xff] %v1170_v11  ;;  %v341_v23 = vmax.f32 %v325_v12, 0.0 }
  0xbf   :  { %v294_v24 = vadd.f32 %v278_v14, %v229_v44  ;;  %v166_v27 = vmul.f32 0.5, %v150_v16  ;;  %v263_v29 = vmul.f32 %v182_v17, %v1167_v8  ;;  %198 = vxpose.xlu1.b32.cont [12/16] %v182_v17, 128  ;;  %v326_v30 = vsub.f32 %v309_v19, %v992_v47  ;;  %v232_v44 = vld [vmem:[%s1537_s5 + $0x68] sm:$0xff]  ;;  %v1230_v14 = vld [vmem:[%s1535_s3 + $0x70] sm:$0xff] }
  0xc0   :  { %v135_v31 = vpop.trf.xlu0  ;;  %v1192_v36 = vmin.f32 %v341_v23, 1.0  ;;  %v250_v16 = vmul.f32 %v956_v22, %v233_v1 }
  0xc1   :  { %v279_v38 = vmul.f32 %v263_v29, %v247_v10  ;;  %v151_v39 = vadd.f32 %v135_v31, %v87_v21  ;;  %v183_v40 = vsub.f32 %v166_v27, %v951_v20  ;;  %v342_v41 = vmax.f32 %v326_v30, 0.0 }
  0xc2   :  { %629 = vst [vmem:[%s1540_s8 + $0x40] sm:$0xff] %v1192_v36  ;;  %v310_v48 = vand.u32 2147483647, %v294_v24  ;;  %v234_v24 = vld [vmem:[%s1537_s5 + $0x78] sm:$0xff] }
  0xc3   :  { %v295_v49 = vadd.f32 %v279_v38, %v230_v63  ;;  %v167_v50 = vmul.f32 0.5, %v151_v39  ;;  %v264_v51 = vmul.f32 %v183_v40, %v1189_v32  ;;  %199 = vxpose.xlu1.b32.cont [13/16] %v183_v40, 128  ;;  %v1206_v53 = vmin.f32 %v342_v41, 1.0  ;;  %v1249_v39 = vld [vmem:[%s1535_s3 + $0x78] sm:$0xff] }
  0xc4   :  { %v136_v55 = vpop.trf.xlu0  ;;  %v327_v57 = vsub.f32 %v310_v48, %v992_v47  ;;  %v249_v63 = vmul.f32 %v956_v22, %v232_v44  ;;  %v251_v40 = vmul.f32 %v956_v22, %v234_v24 }
  0xc5   :  { %v280_v60 = vmul.f32 %v264_v51, %v248_v33  ;;  %v152_v62 = vadd.f32 %v136_v55, %v88_v42  ;;  %v184_v0 = vsub.f32 %v167_v50, %v951_v20  ;;  %630 = vst [vmem:[%s1540_s8 + $0x48] sm:$0xff] %v1206_v53  ;;  %v311_v4 = vand.u32 2147483647, %v295_v49 }
  0xc6   :  { %v343_v3 = vmax.f32 %v327_v57, 0.0 }
  0xc7   :  { %v296_v5 = vadd.f32 %v280_v60, %v231_v18  ;;  %v168_v6 = vmul.f32 0.5, %v152_v62  ;;  %v265_v10 = vmul.f32 %v184_v0, %v1211_v56  ;;  %200 = vxpose.xlu1.b32.cont [14/16] %v184_v0, 128  ;;  %v328_v19 = vsub.f32 %v311_v4, %v992_v47 }
  0xc8   :  { %v137_v12 = vpop.trf.xlu0  ;;  %v1233_v17 = vmin.f32 %v343_v3, 1.0 }
  0xc9   :  { %v281_v21 = vmul.f32 %v265_v10, %v249_v63  ;;  %v153_v23 = vadd.f32 %v137_v12, %v89_v2  ;;  %v185_v18 = vsub.f32 %v168_v6, %v951_v20  ;;  %v312_v27 = vand.u32 2147483647, %v296_v5  ;;  %v365_v12 = vld [vmem:[%s1538_s6] sm:$0xff] }
  0xca   :  { %631 = vst [vmem:[%s1540_s8 + $0x50] sm:$0xff] %v1233_v17  ;;  %v344_v29 = vmax.f32 %v328_v19, 0.0  ;;  %v381_v19 = vmul.f32 %v365_v12, %v956_v22 }
  0xcb   :  { %v297_v30 = vadd.f32 %v281_v21, %v232_v44  ;;  %v169_v31 = vmul.f32 0.5, %v153_v23  ;;  %v266_v33 = vmul.f32 %v185_v18, %v1230_v14  ;;  %201 = vxpose.xlu1.b32.cont [15/16] %v185_v18, 128  ;;  %v329_v38 = vsub.f32 %v312_v27, %v992_v47  ;;  %v366_v23 = vld [vmem:[%s1538_s6 + $0x8] sm:$0xff] }
  0xcc   :  { %v1252_v41 = vmin.f32 %v344_v29, 1.0  ;;  %v382_v29 = vmul.f32 %v366_v23, %v956_v22 }
  0xcd   :  { %v282_v42 = vmul.f32 %v266_v33, %v250_v16  ;;  %v186_v48 = vsub.f32 %v169_v31, %v951_v20  ;;  %v345_v49 = vmax.f32 %v329_v38, 0.0  ;;  %v313_v44 = vand.u32 2147483647, %v297_v30  ;;  %v58_v16 = vld [vmem:[%s1536_s4] sm:$0xff]  ;;  %v367_v31 = vld [vmem:[%s1538_s6 + $0x10] sm:$0xff] }
  0xce   :  { %632 = vst [vmem:[%s1540_s8 + $0x58] sm:$0xff] %v1252_v41 }
  0xcf   :  { %v298_v50 = vadd.f32 %v282_v42, %v233_v1  ;;  %v267_v51 = vmul.f32 %v186_v48, %v1249_v39  ;;  %202 = vxpose.xlu1.b32.end [16/16] %v186_v48, 128  ;;  %v1260_v55 = vmin.f32 %v345_v49, 1.0  ;;  %v330_v57 = vsub.f32 %v313_v44, %v992_v47 }
  0xd0   :  { %v383_v48 = vmul.f32 %v367_v31, %v956_v22 }
  0xd1   :  { %v283_v60 = vmul.f32 %v267_v51, %v251_v40  ;;  %633 = vst [vmem:[%s1540_s8 + $0x60] sm:$0xff] %v1260_v55  ;;  %v346_v20 = vmax.f32 %v330_v57, 0.0  ;;  %v314_v62 = vand.u32 2147483647, %v298_v50  ;;  %v60_v40 = vld [vmem:[%s1536_s4 + $0x10] sm:$0xff]  ;;  %v368_v50 = vld [vmem:[%s1538_s6 + $0x18] sm:$0xff] }
  0xd3   :  { %v299_v0 = vadd.f32 %v283_v60, %v234_v24  ;;  %v1267_v63 = vmin.f32 %v346_v20, 1.0  ;;  %v331_v1 = vsub.f32 %v314_v62, %v992_v47  ;;  %v59_v24 = vld [vmem:[%s1536_s4 + $0x8] sm:$0xff]  ;;  %v61_v20 = vld [vmem:[%s1536_s4 + $0x18] sm:$0xff] }
  0xd5   :  { %634 = vst [vmem:[%s1540_s8 + $0x68] sm:$0xff] %v1267_v63  ;;  %v347_v2 = vmax.f32 %v331_v1, 0.0  ;;  %v315_v3 = vand.u32 2147483647, %v299_v0  ;;  %v384_v1 = vmul.f32 %v368_v50, %v956_v22 }
  0xd7   :  { %v1274_v4 = vmin.f32 %v347_v2, 1.0  ;;  %v332_v5 = vsub.f32 %v315_v3, %v992_v47  ;;  %v369_v2 = vld [vmem:[%s1538_s6 + $0x20] sm:$0xff] }
  0xd9   :  { %635 = vst [vmem:[%s1540_s8 + $0x70] sm:$0xff] %v1274_v4  ;;  %v348_v6 = vmax.f32 %v332_v5, 0.0 }
  0xdb   :  { %v1281_v10 = vmin.f32 %v348_v6, 1.0 }
  0xdd   :  { %636 = vst [vmem:[%s1540_s8 + $0x78] sm:$0xff] %v1281_v10 }
 0x10f   :  { %v203_v21 = vpop.trf.xlu1 }
 0x110   :  { %v397_v18 = vmul.f32 %v203_v21, %v58_v16  ;;  %v62_v21 = vld [vmem:[%s1536_s4 + $0x20] sm:$0xff] }
 0x112   :  { %v413_v27 = vmul.f32 %v397_v18, %v381_v19 }
 0x113   :  { %v204_v30 = vpop.trf.xlu1 }
 0x114   :  { %v429_v33 = vadd.f32 %v413_v27, %v365_v12  ;;  %v398_v38 = vmul.f32 %v204_v30, %v59_v24 }
 0x116   :  { %v414_v42 = vmul.f32 %v398_v38, %v382_v29  ;;  %v445_v49 = vand.u32 2147483647, %v429_v33  ;;  %v370_v29 = vld [vmem:[%s1538_s6 + $0x28] sm:$0xff] }
 0x117   :  { %v205_v44 = vpop.trf.xlu1 }
 0x118   :  { %v430_v51 = vadd.f32 %v414_v42, %v366_v23  ;;  %v399_v57 = vmul.f32 %v205_v44, %v60_v40  ;;  %v461_v60 = vsub.f32 %v445_v49, %v992_v47  ;;  %v385_v23 = vmul.f32 %v369_v2, %v956_v22 }
 0x119   :  { %v386_v49 = vmul.f32 %v370_v29, %v956_v22 }
 0x11a   :  { %v446_v62 = vand.u32 2147483647, %v430_v51  ;;  %v415_v0 = vmul.f32 %v399_v57, %v383_v48  ;;  %v477_v3 = vmax.f32 %v461_v60, 0.0  ;;  %v63_v48 = vld [vmem:[%s1536_s4 + $0x28] sm:$0xff]  ;;  %v371_v60 = vld [vmem:[%s1538_s6 + $0x30] sm:$0xff] }
 0x11b   :  { %v206_v5 = vpop.trf.xlu1 }
 0x11c   :  { %v431_v6 = vadd.f32 %v415_v0, %v367_v31  ;;  %v400_v12 = vmul.f32 %v206_v5, %v61_v20  ;;  %v493_v16 = vmin.f32 %v477_v3, 1.0  ;;  %v462_v19 = vsub.f32 %v446_v62, %v992_v47 }
 0x11d   :  { %v832_v5 = vmov 0.0  }
 0x11e   :  { %v447_v18 = vand.u32 2147483647, %v431_v6  ;;  %v416_v24 = vmul.f32 %v400_v12, %v384_v1  ;;  %v525_v27 = vmul.f32 %v493_v16, %v493_v16  ;;  %v478_v30 = vmax.f32 %v462_v19, 0.0  ;;  %657 = vst [vmem:[%s1542_s10] sm:$0x1] %v832_v5  ;;  %v64_v6 = vld [vmem:[%s1536_s4 + $0x30] sm:$0xff] }
 0x11f   :  { %v207_v33 = vpop.trf.xlu1  ;;  %v387_v12 = vmul.f32 %v371_v60, %v956_v22 }
 0x120   :  { %v432_v31 = vadd.f32 %v416_v24, %v368_v50  ;;  %v401_v38 = vmul.f32 %v207_v33, %v62_v21  ;;  %541 = vxpose.xlu0.b32.start [1/16] %v525_v27, 128  ;;  %v494_v40 = vmin.f32 %v478_v30, 1.0  ;;  %v463_v42 = vsub.f32 %v447_v18, %v992_v47 }
 0x122   :  { %v448_v44 = vand.u32 2147483647, %v432_v31  ;;  %v417_v51 = vmul.f32 %v401_v38, %v385_v23  ;;  %v526_v57 = vmul.f32 %v494_v40, %v494_v40  ;;  %v479_v20 = vmax.f32 %v463_v42, 0.0  ;;  %v65_v31 = vld [vmem:[%s1536_s4 + $0x38] sm:$0xff] }
 0x123   :  { %v208_v50 = vpop.trf.xlu1 }
 0x124   :  { %v433_v62 = vadd.f32 %v417_v51, %v369_v2  ;;  %v402_v0 = vmul.f32 %v208_v50, %v63_v48  ;;  %542 = vxpose.xlu0.b32.cont [2/16] %v526_v57, 128  ;;  %v495_v1 = vmin.f32 %v479_v20, 1.0  ;;  %v464_v3 = vsub.f32 %v448_v44, %v992_v47  ;;  %v372_v2 = vld [vmem:[%s1538_s6 + $0x38] sm:$0xff] }
 0x125   :  { %v388_v38 = vmul.f32 %v372_v2, %v956_v22 }
 0x126   :  { %v449_v16 = vand.u32 2147483647, %v433_v62  ;;  %v418_v19 = vmul.f32 %v402_v0, %v386_v49  ;;  %v527_v21 = vmul.f32 %v495_v1, %v495_v1  ;;  %v480_v23 = vmax.f32 %v464_v3, 0.0  ;;  %v373_v49 = vld [vmem:[%s1538_s6 + $0x40] sm:$0xff] }
 0x127   :  { %v209_v18 = vpop.trf.xlu1  ;;  %v66_v62 = vld [vmem:[%s1536_s4 + $0x40] sm:$0xff]  ;;  %v389_v0 = vmul.f32 %v373_v49, %v956_v22 }
 0x128   :  { %v434_v24 = vadd.f32 %v418_v19, %v370_v29  ;;  %v403_v27 = vmul.f32 %v209_v18, %v64_v6  ;;  %543 = vxpose.xlu0.b32.cont [3/16] %v527_v21, 128  ;;  %v496_v30 = vmin.f32 %v480_v23, 1.0  ;;  %v465_v33 = vsub.f32 %v449_v16, %v992_v47  ;;  %v374_v6 = vld [vmem:[%s1538_s6 + $0x48] sm:$0xff] }
 0x129   :  { %v67_v18 = vld [vmem:[%s1536_s4 + $0x48] sm:$0xff] }
 0x12a   :  { %v450_v40 = vand.u32 2147483647, %v434_v24  ;;  %v419_v42 = vmul.f32 %v403_v27, %v387_v12  ;;  %v528_v48 = vmul.f32 %v496_v30, %v496_v30  ;;  %v481_v44 = vmax.f32 %v465_v33, 0.0 }
 0x12b   :  { %v210_v29 = vpop.trf.xlu1  ;;  %v390_v24 = vmul.f32 %v374_v6, %v956_v22 }
 0x12c   :  { %v435_v51 = vadd.f32 %v419_v42, %v371_v60  ;;  %v404_v57 = vmul.f32 %v210_v29, %v65_v31  ;;  %544 = vxpose.xlu0.b32.cont [4/16] %v528_v48, 128  ;;  %v497_v20 = vmin.f32 %v481_v44, 1.0  ;;  %v466_v50 = vsub.f32 %v450_v40, %v992_v47  ;;  %v375_v31 = vld [vmem:[%s1538_s6 + $0x50] sm:$0xff] }
 0x12d   :  { %v68_v29 = vld [vmem:[%s1536_s4 + $0x50] sm:$0xff] }
 0x12e   :  { %v451_v1 = vand.u32 2147483647, %v435_v51  ;;  %v420_v3 = vmul.f32 %v404_v57, %v388_v38  ;;  %v529_v5 = vmul.f32 %v497_v20, %v497_v20  ;;  %v482_v12 = vmax.f32 %v466_v50, 0.0 }
 0x12f   :  { %v211_v60 = vpop.trf.xlu1  ;;  %v391_v51 = vmul.f32 %v375_v31, %v956_v22 }
 0x130   :  { %v436_v16 = vadd.f32 %v420_v3, %v372_v2  ;;  %v405_v19 = vmul.f32 %v211_v60, %v66_v62  ;;  %545 = vxpose.xlu0.b32.cont [5/16] %v529_v5, 128  ;;  %v498_v21 = vmin.f32 %v482_v12, 1.0  ;;  %v467_v23 = vsub.f32 %v451_v1, %v992_v47  ;;  %v376_v62 = vld [vmem:[%s1538_s6 + $0x58] sm:$0xff] }
 0x131   :  { %v69_v60 = vld [vmem:[%s1536_s4 + $0x58] sm:$0xff] }
 0x132   :  { %v452_v27 = vand.u32 2147483647, %v436_v16  ;;  %v421_v30 = vmul.f32 %v405_v19, %v389_v0  ;;  %v530_v33 = vmul.f32 %v498_v21, %v498_v21  ;;  %v483_v38 = vmax.f32 %v467_v23, 0.0 }
 0x133   :  { %v212_v2 = vpop.trf.xlu1  ;;  %v392_v16 = vmul.f32 %v376_v62, %v956_v22 }
 0x134   :  { %v437_v40 = vadd.f32 %v421_v30, %v373_v49  ;;  %v406_v42 = vmul.f32 %v212_v2, %v67_v18  ;;  %546 = vxpose.xlu0.b32.cont [6/16] %v530_v33, 128  ;;  %v499_v48 = vmin.f32 %v483_v38, 1.0  ;;  %v468_v44 = vsub.f32 %v452_v27, %v992_v47  ;;  %v377_v18 = vld [vmem:[%s1538_s6 + $0x60] sm:$0xff] }
 0x135   :  { %v70_v2 = vld [vmem:[%s1536_s4 + $0x60] sm:$0xff] }
 0x136   :  { %v453_v57 = vand.u32 2147483647, %v437_v40  ;;  %v422_v20 = vmul.f32 %v406_v42, %v390_v24  ;;  %v531_v50 = vmul.f32 %v499_v48, %v499_v48  ;;  %v484_v0 = vmax.f32 %v468_v44, 0.0 }
 0x137   :  { %v213_v49 = vpop.trf.xlu1  ;;  %v393_v40 = vmul.f32 %v377_v18, %v956_v22 }
 0x138   :  { %v438_v1 = vadd.f32 %v422_v20, %v374_v6  ;;  %v407_v3 = vmul.f32 %v213_v49, %v68_v29  ;;  %547 = vxpose.xlu0.b32.cont [7/16] %v531_v50, 128  ;;  %v500_v5 = vmin.f32 %v484_v0, 1.0  ;;  %v469_v12 = vsub.f32 %v453_v57, %v992_v47  ;;  %v378_v29 = vld [vmem:[%s1538_s6 + $0x68] sm:$0xff] }
 0x139   :  { %v71_v49 = vld [vmem:[%s1536_s4 + $0x68] sm:$0xff] }
 0x13a   :  { %v454_v19 = vand.u32 2147483647, %v438_v1  ;;  %v423_v21 = vmul.f32 %v407_v3, %v391_v51  ;;  %v532_v23 = vmul.f32 %v500_v5, %v500_v5  ;;  %v485_v24 = vmax.f32 %v469_v12, 0.0 }
 0x13b   :  { %v214_v6 = vpop.trf.xlu1  ;;  %v394_v1 = vmul.f32 %v378_v29, %v956_v22 }
 0x13c   :  { %v439_v27 = vadd.f32 %v423_v21, %v375_v31  ;;  %v408_v30 = vmul.f32 %v214_v6, %v69_v60  ;;  %548 = vxpose.xlu0.b32.cont [8/16] %v532_v23, 128  ;;  %v501_v33 = vmin.f32 %v485_v24, 1.0  ;;  %v470_v38 = vsub.f32 %v454_v19, %v992_v47  ;;  %v379_v60 = vld [vmem:[%s1538_s6 + $0x70] sm:$0xff] }
 0x13d   :  { %v72_v6 = vld [vmem:[%s1536_s4 + $0x70] sm:$0xff] }
 0x13e   :  { %v455_v42 = vand.u32 2147483647, %v439_v27  ;;  %v424_v48 = vmul.f32 %v408_v30, %v392_v16  ;;  %v533_v44 = vmul.f32 %v501_v33, %v501_v33  ;;  %v486_v51 = vmax.f32 %v470_v38, 0.0 }
 0x13f   :  { %v215_v31 = vpop.trf.xlu1  ;;  %v395_v27 = vmul.f32 %v379_v60, %v956_v22 }
 0x140   :  { %v440_v57 = vadd.f32 %v424_v48, %v376_v62  ;;  %v409_v20 = vmul.f32 %v215_v31, %v70_v2  ;;  %549 = vxpose.xlu0.b32.cont [9/16] %v533_v44, 128  ;;  %v502_v50 = vmin.f32 %v486_v51, 1.0  ;;  %v471_v0 = vsub.f32 %v455_v42, %v992_v47  ;;  %v380_v2 = vld [vmem:[%s1538_s6 + $0x78] sm:$0xff] }
 0x142   :  { %v456_v3 = vand.u32 2147483647, %v440_v57  ;;  %v425_v5 = vmul.f32 %v409_v20, %v393_v40  ;;  %v534_v12 = vmul.f32 %v502_v50, %v502_v50  ;;  %v487_v16 = vmax.f32 %v471_v0, 0.0  ;;  %v73_v57 = vld [vmem:[%s1536_s4 + $0x78] sm:$0xff] }
 0x143   :  { %v216_v62 = vpop.trf.xlu1  ;;  %v396_v20 = vmul.f32 %v380_v2, %v956_v22 }
 0x144   :  { %v441_v19 = vadd.f32 %v425_v5, %v377_v18  ;;  %v410_v21 = vmul.f32 %v216_v62, %v71_v49  ;;  %550 = vxpose.xlu0.b32.cont [10/16] %v534_v12, 128  ;;  %v503_v23 = vmin.f32 %v487_v16, 1.0  ;;  %v472_v24 = vsub.f32 %v456_v3, %v992_v47  ;;  %v658_v18 = vld [vmem:[%s1539_s7] sm:$0x1] }
 0x145   :  { %659 = vst [vmem:[#allocation4] sm:$0x1] %v658_v18 }
 0x146   :  { %v457_v30 = vand.u32 2147483647, %v441_v19  ;;  %v426_v33 = vmul.f32 %v410_v21, %v394_v1  ;;  %v535_v38 = vmul.f32 %v503_v23, %v503_v23  ;;  %v488_v40 = vmax.f32 %v472_v24, 0.0 }
 0x147   :  { %v217_v42 = vpop.trf.xlu1 }
 0x148   :  { %v442_v48 = vadd.f32 %v426_v33, %v378_v29  ;;  %v411_v44 = vmul.f32 %v217_v42, %v72_v6  ;;  %551 = vxpose.xlu0.b32.cont [11/16] %v535_v38, 128  ;;  %v504_v51 = vmin.f32 %v488_v40, 1.0  ;;  %v473_v31 = vsub.f32 %v457_v30, %v992_v47 }
 0x14a   :  { %v458_v50 = vand.u32 2147483647, %v442_v48  ;;  %v427_v0 = vmul.f32 %v411_v44, %v395_v27  ;;  %v536_v49 = vmul.f32 %v504_v51, %v504_v51  ;;  %v489_v1 = vmax.f32 %v473_v31, 0.0 }
 0x14b   :  { %v218_v3 = vpop.trf.xlu1 }
 0x14c   :  { %v443_v5 = vadd.f32 %v427_v0, %v379_v60  ;;  %v412_v12 = vmul.f32 %v218_v3, %v73_v57  ;;  %552 = vxpose.xlu0.b32.cont [12/16] %v536_v49, 128  ;;  %v505_v29 = vmin.f32 %v489_v1, 1.0  ;;  %v474_v16 = vsub.f32 %v458_v50, %v992_v47 }
 0x14d   :  { %v510_v57 = vmul.f32 %v1044_v28, %v1044_v28  ;;  %v511_v49 = vmul.f32 %v1066_v46, %v1066_v46  ;;  %v513_v46 = vmul.f32 %v1107_v15, %v1107_v15  ;;  %v727_v15 = vld [vmem:[%s1542_s10] sm:$0x1] }
 0x14e   :  { %v459_v62 = vand.u32 2147483647, %v443_v5  ;;  %v428_v19 = vmul.f32 %v412_v12, %v396_v20  ;;  %v537_v21 = vmul.f32 %v505_v29, %v505_v29  ;;  %v490_v23 = vmax.f32 %v474_v16, 0.0 }
 0x150   :  { %v444_v24 = vadd.f32 %v428_v19, %v380_v2  ;;  %553 = vxpose.xlu0.b32.cont [13/16] %v537_v21, 128  ;;  %v506_v6 = vmin.f32 %v490_v23, 1.0  ;;  %v475_v22 = vsub.f32 %v459_v62, %v992_v47  ;;  %v509_v2 = vmul.f32 %v1017_v7, %v1017_v7 }
 0x152   :  { %v460_v30 = vand.u32 2147483647, %v444_v24  ;;  %v538_v27 = vmul.f32 %v506_v6, %v506_v6  ;;  %v491_v33 = vmax.f32 %v475_v22, 0.0  ;;  %v514_v22 = vmul.f32 %v1129_v37, %v1129_v37 }
 0x154   :  { %554 = vxpose.xlu0.b32.cont [14/16] %v538_v27, 128  ;;  %v507_v38 = vmin.f32 %v491_v33, 1.0  ;;  %v476_v60 = vsub.f32 %v460_v30, %v992_v47 }
 0x156   :  { %v539_v40 = vmul.f32 %v507_v38, %v507_v38  ;;  %v492_v18 = vmax.f32 %v476_v60, 0.0 }
 0x158   :  { %555 = vxpose.xlu0.b32.cont [15/16] %v539_v40, 128  ;;  %v508_v42 = vmin.f32 %v492_v18, 1.0  ;;  %v515_v40 = vmul.f32 %v1143_v52, %v1143_v52 }
 0x15a   :  { %v540_v48 = vmul.f32 %v508_v42, %v508_v42 }
 0x15c   :  { %556 = vxpose.xlu0.b32.end [16/16] %v540_v48, 128 }
 0x19c   :  { %v557_v44 = vpop.trf.xlu0 }
 0x19d   :  { %v573_v51 = vadd.f32 %v557_v44, %v509_v2  ;;  %v516_v2 = vmul.f32 %v1170_v11, %v1170_v11 }
 0x19f   :  { %v589_v31 = vmul.f32 0.5, %v573_v51 }
 0x1a0   :  { %v558_v20 = vpop.trf.xlu0 }
 0x1a1   :  { %v605_v50 = vmul.f32 %v589_v31, %v961_v25  ;;  %v574_v0 = vadd.f32 %v558_v20, %v510_v57  ;;  %v512_v25 = vmul.f32 %v1080_v58, %v1080_v58  ;;  %v517_v31 = vmul.f32 %v1192_v36, %v1192_v36 }
 0x1a3   :  { %637 = vst [vmem:[%s1541_s9] sm:$0xff] %v605_v50  ;;  %v590_v47 = vmul.f32 0.5, %v574_v0  ;;  %v518_v0 = vmul.f32 %v1206_v53, %v1206_v53  ;;  %v519_v53 = vmul.f32 %v1233_v17, %v1233_v17 }
 0x1a4   :  { %v559_v1 = vpop.trf.xlu0 }
 0x1a5   :  { %v606_v7 = vmul.f32 %v590_v47, %v975_v34  ;;  %v575_v3 = vadd.f32 %v559_v1, %v511_v49  ;;  %v758_v1 = vstv %s790_s22 }
 0x1a7   :  { %638 = vst [vmem:[%s1541_s9 + $0x8] sm:$0xff] %v606_v7  ;;  %v728_v28 = vadd.f32 %v606_v7, %v605_v50  ;;  %v591_v5 = vmul.f32 0.5, %v575_v3  ;;  %v754_v3 = vld [vmem:[%s1539_s7] sm:$0x1] }
 0x1a8   :  { %v560_v12 = vpop.trf.xlu0 }
 0x1a9   :  { %v743_v29 = vrot.slane %v728_v28, 4  ;;  %v607_v16 = vmul.f32 %v591_v5, %v989_v45  ;;  %v576_v62 = vadd.f32 %v560_v12, %v512_v25 }
 0x1ab   :  { %v744_v19 = vadd.f32 %v743_v29, %v728_v28  ;;  %639 = vst [vmem:[%s1541_s9 + $0x10] sm:$0xff] %v607_v16  ;;  %v592_v34 = vmul.f32 0.5, %v576_v62  ;;  %v520_v62 = vmul.f32 %v1252_v41, %v1252_v41 }
 0x1ac   :  { %v561_v21 = vpop.trf.xlu0 }
 0x1ad   :  { %v745_v23 = vrot.slane %v744_v19, 2  ;;  %v608_v24 = vmul.f32 %v592_v34, %v1006_v59  ;;  %v577_v6 = vadd.f32 %v561_v21, %v513_v46 }
 0x1af   :  { %v746_v58 = vadd.f32 %v745_v23, %v744_v19  ;;  %640 = vst [vmem:[%s1541_s9 + $0x18] sm:$0xff] %v608_v24  ;;  %v593_v45 = vmul.f32 0.5, %v577_v6 }
 0x1b0   :  { %v562_v30 = vpop.trf.xlu0 }
 0x1b1   :  { %v747_v27 = vrot.slane %v746_v58, 1  ;;  %v609_v33 = vmul.f32 %v593_v45, %v1022_v9  ;;  %v578_v38 = vadd.f32 %v562_v30, %v514_v22 }
 0x1b3   :  { %v748_v59 = vadd.f32 %v747_v27, %v746_v58  ;;  %641 = vst [vmem:[%s1541_s9 + $0x20] sm:$0xff] %v609_v33  ;;  %v594_v60 = vmul.f32 0.5, %v578_v38 }
 0x1b4   :  { %v563_v18 = vpop.trf.xlu0 }
 0x1b5   :  { %v749_v37 = vadd.f32 %v748_v59, %v727_v15  ;;  %v610_v42 = vmul.f32 %v594_v60, %v1041_v26  ;;  %v579_v48 = vadd.f32 %v563_v18, %v515_v40 }
 0x1b7   :  { %750 = vst [vmem:[%s1542_s10] sm:$0x1] %v749_v37  ;;  %642 = vst [vmem:[%s1541_s9 + $0x28] sm:$0xff] %v610_v42  ;;  %v595_v9 = vmul.f32 0.5, %v579_v48 }
 0x1b8   :  { %v564_v44 = vpop.trf.xlu0 }
 0x1b9   :  { %v611_v52 = vmul.f32 %v595_v9, %v1063_v43  ;;  %v580_v51 = vadd.f32 %v564_v44, %v516_v2 }
 0x1bb   :  { %643 = vst [vmem:[%s1541_s9 + $0x30] sm:$0xff] %v611_v52  ;;  %v596_v26 = vmul.f32 0.5, %v580_v51 }
 0x1bc   :  { %v565_v57 = vpop.trf.xlu0 }
 0x1bd   :  { %v612_v20 = vmul.f32 %v596_v26, %v1085_v61  ;;  %v581_v50 = vadd.f32 %v565_v57, %v517_v31 }
 0x1be   :  { %v755_v11 = vld [vmem:[%s1542_s10] sm:$0x1]  ;;  %s833_s10 = smov [#allocation4]  }
 0x1bf   :  { %644 = vst [vmem:[%s1541_s9 + $0x38] sm:$0xff] %v612_v20  ;;  %v597_v43 = vmul.f32 0.5, %v581_v50  ;;  %v791_v47 = vadd.f32 -1.0, %v755_v11  ;;  %s774_s27 = sshll.u32 %s833_s10, 4  ;;  %s775_s27 = int_to_ptr.vmem [resolvable:$true] %s774_s27 }
 0x1c0   :  { %v566_v49 = vpop.trf.xlu0  ;;  %s807_s7 = scalar_lea.vmem %s775_s27, 16  ;;  %s811_s29 = scalar_lea.vmem %s775_s27, 32 }
 0x1c1   :  { %v613_v36 = vmul.f32 %v597_v43, %v1104_v13  ;;  %v582_v7 = vadd.f32 %v566_v49, %v518_v0  ;;  %v757_v61 = vmax.f32 %v791_v47, 0.0  ;;  %p808_p5 = scmp.ne.s32.totalorder %s775_s27, %s807_s7  ;;  %p812_p6 = scmp.lt.s32.totalorder %s775_s27, %s775_s27 }
 0x1c2   :  { %p813_p7 = scmp.lt.s32.totalorder %s811_s29, %s807_s7 }
 0x1c3   :  { %645 = vst [vmem:[%s1541_s9 + $0x40] sm:$0xff] %v613_v36  ;;  %v598_v28 = vmul.f32 0.5, %v582_v7  ;;  %v759_v5 = vmul.f32 %v758_v1, %v757_v61 }
 0x1c4   :  { %v567_v25 = vpop.trf.xlu0  ;;  %p814_p8 = por %p813_p7, %p812_p6 }
 0x1c5   :  { %v614_v13 = vmul.f32 %v598_v28, %v1126_v35  ;;  %v583_v12 = vadd.f32 %v567_v25, %v519_v53  ;;  %v760_v29 = vadd.f32 %v759_v5, %v754_v3 }
 0x1c6   :  { %p815_p9 = pnand %p814_p8, %p808_p5 }
 0x1c7   :  { %646 = vst [vmem:[%s1541_s9 + $0x48] sm:$0xff] %v614_v13  ;;  %v599_v16 = vmul.f32 0.5, %v583_v12  ;;  %761 = vst [vmem:[#allocation4] sm:$0x1] %v760_v29 }
 0x1c8   :  { %v568_v19 = vpop.trf.xlu0 }
 0x1c9   :  { %818 = shalt.err (!%p815_p9)
}
 0x1ca   :  { %777 = dma.vmem_to_hbm [thread:$0]  %s775_s27, 16, %s1543_s11, [#allocation5]   ;;  %v615_v35 = vmul.f32 %v599_v16, %v1148_v54  ;;  %v584_v17 = vadd.f32 %v568_v19, %v520_v62  ;;  %v521_v34 = vmul.f32 %v1260_v55, %v1260_v55  ;;  %v522_v54 = vmul.f32 %v1267_v63, %v1267_v63 }
 0x1cc   :  { %647 = vst [vmem:[%s1541_s9 + $0x50] sm:$0xff] %v615_v35  ;;  %v600_v41 = vmul.f32 0.5, %v584_v17  ;;  %v569_v46 = vpop.trf.xlu0 }
 0x1cd   :  { %v585_v23 = vadd.f32 %v569_v46, %v521_v34 }
 0x1ce   :  { %v616_v21 = vmul.f32 %v600_v41, %v1167_v8  ;;  %v523_v8 = vmul.f32 %v1274_v4, %v1274_v4 }
 0x1cf   :  { %v601_v24 = vmul.f32 0.5, %v585_v23 }
 0x1d0   :  { %648 = vst [vmem:[%s1541_s9 + $0x58] sm:$0xff] %v616_v21  ;;  %v570_v6 = vpop.trf.xlu0 }
 0x1d1   :  { %v617_v58 = vmul.f32 %v601_v24, %v1189_v32  ;;  %v586_v45 = vadd.f32 %v570_v6, %v522_v54  ;;  %v524_v32 = vmul.f32 %v1281_v10, %v1281_v10 }
 0x1d3   :  { %649 = vst [vmem:[%s1541_s9 + $0x60] sm:$0xff] %v617_v58  ;;  %v602_v55 = vmul.f32 0.5, %v586_v45 }
 0x1d4   :  { %v571_v22 = vpop.trf.xlu0 }
 0x1d5   :  { %v618_v30 = vmul.f32 %v602_v55, %v1211_v56  ;;  %v587_v27 = vadd.f32 %v571_v22, %v523_v8 }
 0x1d7   :  { %650 = vst [vmem:[%s1541_s9 + $0x68] sm:$0xff] %v618_v30  ;;  %v603_v63 = vmul.f32 0.5, %v587_v27 }
 0x1d8   :  { %v572_v33 = vpop.trf.xlu0 }
 0x1d9   :  { %v619_v38 = vmul.f32 %v603_v63, %v1230_v14  ;;  %v588_v15 = vadd.f32 %v572_v33, %v524_v32 }
 0x1db   :  { %651 = vst [vmem:[%s1541_s9 + $0x70] sm:$0xff] %v619_v38  ;;  %v604_v4 = vmul.f32 0.5, %v588_v15 }
 0x1dd   :  { %v620_v56 = vmul.f32 %v604_v4, %v1249_v39 }
 0x1df   :  { %652 = vst [vmem:[%s1541_s9 + $0x78] sm:$0xff] %v620_v56 }
 0x1e0   :  { %829 = dma.done.wait [#allocation5], 16  }
 0x1e1   :  { %830 = vsyncadd [#allocation5], 4294967280 }
 0x1e2   :  { %787 = vsyncpa [#allocation5], 1 }

</bundles_post_ra>
